<compile_context>
chip_gen: v6e
topology: v6e:2x2x1
jax: 0.10.0
libtpu: 0.0.40
codegen_flags: <defaults>
</compile_context>

<pallas_src>
import math

import jax
import jax.numpy as jnp
from jax import lax
from jax.experimental import pallas as pl
from jax.experimental.pallas import tpu as pltpu


def _make_kernel(S_pad, TS):
    """Build the kernel for static padded sequence length / sequence tile."""

    unroll = TS <= 32  # fully unroll the DMA issue/wait loops for small tiles

    def kernel(tok_ids_smem,          # (B*S_pad,) int32 — scalar prefetch (SMEM)
               seg_ids_ref,           # (TS, 1)  int32 (VMEM)
               tok_tbl_hbm,           # (V, D)   vocab table, stays in HBM (ANY)
               seg_tbl_ref,           # (3, D)   segment table (VMEM)
               pe_ref,                # (TS, D)  positional slice (VMEM)
               ln_w_ref, ln_b_ref,    # (1, D)   LayerNorm params (VMEM)
               out_ref,               # (TS, D)  output block (VMEM)
               gbuf,                  # (2, TS, D) gather scratch (VMEM)
               sem):                  # (2,)     DMA semaphores
        b = pl.program_id(0)
        s = pl.program_id(1)

        def issue_gather(blk, slot):
            # Start TS single-row DMAs: vocab row tok_ids[base+i] -> gbuf[slot, i].
            base = b * S_pad + blk * TS

            def body(i, carry):
                tid = tok_ids_smem[base + i]
                pltpu.make_async_copy(
                    tok_tbl_hbm.at[pl.ds(tid, 1)],     # (1, D) row in HBM
                    gbuf.at[slot, pl.ds(i, 1)],        # (1, D) row in VMEM
                    sem.at[slot]).start()
                return carry

            lax.fori_loop(0, TS, body, 0, unroll=unroll)

        slot = lax.rem(s, 2)

        # Prologue: prime slot 0 with this batch row's first block.
        @pl.when(s == 0)
        def _():
            issue_gather(0, 0)

        # Prefetch next sequence block into the other slot (overlaps with the
        # wait + compute + store of the current block).
        @pl.when(s + 1 < pl.num_programs(1))
        def _():
            issue_gather(s + 1, 1 - slot)

        # Wait for the TS row copies of the current slot (equal-sized waits on
        # the shared per-slot semaphore).
        def wait_body(i, carry):
            pltpu.make_async_copy(
                tok_tbl_hbm.at[pl.ds(0, 1)],
                gbuf.at[slot, pl.ds(i, 1)],
                sem.at[slot]).wait()
            return carry

        lax.fori_loop(0, TS, wait_body, 0, unroll=unroll)

        tok_emb = gbuf[slot].astype(jnp.float32)               # (TS, D)

        # Segment embedding: 3-row table -> two vectorized selects (no gather).
        g = seg_ids_ref[...]                                    # (TS, 1)
        seg_emb = jnp.where(
            g == 0, seg_tbl_ref[0:1, :],
            jnp.where(g == 1, seg_tbl_ref[1:2, :], seg_tbl_ref[2:3, :])
        ).astype(jnp.float32)                                   # (TS, D)

        x = tok_emb + seg_emb + pe_ref[...].astype(jnp.float32)

        # LayerNorm (f32, eps matches torch.nn.LayerNorm default).
        mean = jnp.mean(x, axis=-1, keepdims=True)
        var = jnp.mean((x - mean) ** 2, axis=-1, keepdims=True)
        xhat = (x - mean) * lax.rsqrt(var + 1e-5)
        y = xhat * ln_w_ref[...].astype(jnp.float32) + ln_b_ref[...].astype(jnp.float32)
        out_ref[...] = y.astype(out_ref.dtype)

    return kernel


def bert_embedding(tok_ids, seg_ids, tok_tbl, seg_tbl, pe_full, ln_w, ln_b,
                   *, seq_tile=256):
    """tok_ids, seg_ids: [B, S] int32. Returns [B, S, D] float32."""
    B, S = tok_ids.shape
    V, D = tok_tbl.shape

    # ---- padding / tiling of the sequence axis --------------------------
    S_pad = ((S + 7) // 8) * 8                       # sublane-aligned
    TS = min(seq_tile, S_pad)
    TS = max(8, (TS // 8) * 8)
    while S_pad % TS != 0:                           # TS must divide S_pad
        TS -= 8
    SB = S_pad // TS

    pe = pe_full[:S]                                 # pe[:, :x.size(1)]
    if S_pad != S:
        pad = S_pad - S
        tok_ids = jnp.pad(tok_ids, ((0, 0), (0, pad)))   # pad with id 0 (valid)
        seg_ids = jnp.pad(seg_ids, ((0, 0), (0, pad)))
        pe = jnp.pad(pe, ((0, pad), (0, 0)))

    tok_ids_flat = tok_ids.astype(jnp.int32).reshape(B * S_pad)   # SMEM prefetch
    seg_ids3 = seg_ids.astype(jnp.int32).reshape(B, S_pad, 1)
    ln_w2 = ln_w.reshape(1, D)
    ln_b2 = ln_b.reshape(1, D)

    grid_spec = pltpu.PrefetchScalarGridSpec(
        num_scalar_prefetch=1,                       # token ids -> SMEM
        grid=(B, SB),
        in_specs=[
            pl.BlockSpec((None, TS, 1), lambda b, s, ids: (b, s, 0)),  # seg ids (tiny)
            pl.BlockSpec(memory_space=pl.ANY),                          # vocab table (HBM)
            pl.BlockSpec((3, D), lambda b, s, ids: (0, 0)),             # segment table
            pl.BlockSpec((TS, D), lambda b, s, ids: (s, 0)),            # positional slice
            pl.BlockSpec((1, D), lambda b, s, ids: (0, 0)),             # LN weight
            pl.BlockSpec((1, D), lambda b, s, ids: (0, 0)),             # LN bias
        ],
        out_specs=pl.BlockSpec((None, TS, D), lambda b, s, ids: (b, s, 0)),
        scratch_shapes=[
            pltpu.VMEM((2, TS, D), tok_tbl.dtype),   # double-buffered gather rows
            pltpu.SemaphoreType.DMA((2,)),           # one DMA sem per slot
        ],
    )

    out = pl.pallas_call(
        _make_kernel(S_pad, TS),
        out_shape=jax.ShapeDtypeStruct((B, S_pad, D), jnp.float32),
        grid_spec=grid_spec,
        compiler_params=pltpu.CompilerParams(
            dimension_semantics=("parallel", "arbitrary")),
    )(tok_ids_flat, seg_ids3, tok_tbl, seg_tbl, pe, ln_w2, ln_b2)

    return out[:, :S, :]


def make_positional_table(d_model, max_len=512):
    pos = jnp.arange(max_len, dtype=jnp.float32)[:, None]
    div_term = jnp.exp(
        jnp.arange(0, d_model, 2, dtype=jnp.float32) * (-math.log(10000.0) / d_model))
    pe = jnp.zeros((max_len, d_model), dtype=jnp.float32)
    pe = pe.at[:, 0::2].set(jnp.sin(pos * div_term))
    pe = pe.at[:, 1::2].set(jnp.cos(pos * div_term))
    return pe


def reference(tok_ids, seg_ids, tok_tbl, seg_tbl, pe_full, ln_w, ln_b):
    S = tok_ids.shape[1]
    x = tok_tbl[tok_ids] + pe_full[None, :S] + seg_tbl[seg_ids]
    mean = jnp.mean(x, axis=-1, keepdims=True)
    var = jnp.mean((x - mean) ** 2, axis=-1, keepdims=True)
    return (x - mean) * lax.rsqrt(var + 1e-5) * ln_w + ln_b


if __name__ == "__main__":
    # TODO(synk): dropout from the module docstring is never applied in forward(), so it is omitted.
    B, S, D, V, MAX_LEN = 2, 8, 128, 64, 512

    key = jax.random.PRNGKey(0)
    k_tok, k_seg, k_ids, k_sids = jax.random.split(key, 4)

    tok_tbl = jax.random.normal(k_tok, (V, D), dtype=jnp.float32)
    seg_tbl = jax.random.normal(k_seg, (3, D), dtype=jnp.float32)
    ln_w = jnp.ones((D,), dtype=jnp.float32)       # torch.nn.LayerNorm default init
    ln_b = jnp.zeros((D,), dtype=jnp.float32)
    pe_full = make_positional_table(D, MAX_LEN)

    # ---- test 1: single sequence block (SB == 1) ------------------------
    tok_ids = jax.random.randint(k_ids, (B, S), 0, V, dtype=jnp.int32)
    seg_ids = jax.random.randint(k_sids, (B, S), 0, 3, dtype=jnp.int32)

    ref = reference(tok_ids, seg_ids, tok_tbl, seg_tbl, pe_full, ln_w, ln_b)
    out = bert_embedding(tok_ids, seg_ids, tok_tbl, seg_tbl, pe_full, ln_w, ln_b)
    out = jax.block_until_ready(out)
    assert out.shape == (B, S, D)
    assert jnp.allclose(out, ref, atol=1e-4, rtol=1e-4), "mismatch (single block)"

    # ---- test 2: multiple sequence blocks + padding (double-buffered gather)
    S2 = 20                                         # pads to 24, TS=8 -> 3 blocks
    tok_ids2 = jax.random.randint(jax.random.PRNGKey(1), (B, S2), 0, V, dtype=jnp.int32)
    seg_ids2 = jax.random.randint(jax.random.PRNGKey(2), (B, S2), 0, 3, dtype=jnp.int32)

    ref2 = reference(tok_ids2, seg_ids2, tok_tbl, seg_tbl, pe_full, ln_w, ln_b)
    out2 = bert_embedding(tok_ids2, seg_ids2, tok_tbl, seg_tbl, pe_full, ln_w, ln_b,
                          seq_tile=8)
    out2 = jax.block_until_ready(out2)
    assert out2.shape == (B, S2, D)
    assert jnp.allclose(out2, ref2, atol=1e-4, rtol=1e-4), "mismatch (multi block)"

    print("KERNEL_OK")
</pallas_src>

<mosaic_0001>
module attributes {stable_mosaic.version = 11 : i64} {
  func.func @kernel(%arg0: i32, %arg1: i32, %arg2: memref<16xi32, #tpu.memory_space<smem>>, %arg3: memref<1x8x1xi32, #tpu.memory_space<vmem>>, %arg4: memref<64x128xf32, #tpu.memory_space<any>>, %arg5: memref<3x128xf32, #tpu.memory_space<vmem>>, %arg6: memref<8x128xf32, #tpu.memory_space<vmem>>, %arg7: memref<1x128xf32, #tpu.memory_space<vmem>>, %arg8: memref<1x128xf32, #tpu.memory_space<vmem>>, %arg9: memref<1x8x128xf32, #tpu.memory_space<vmem>>, %arg10: memref<2x8x128xf32, #tpu.memory_space<vmem>>, %arg11: memref<2x!tpu.dma_semaphore, #tpu.memory_space<semaphore_mem>>) attributes {dimension_semantics = [#tpu.dimension_semantics<parallel>, #tpu.dimension_semantics<arbitrary>], iteration_bounds = array<i64: 2, 1>, scalar_prefetch = 1 : i64, scratch_operands = 2 : i64, tpu.core_type = #tpu.core_type<tc>, window_params = [{transform_indices = @transform_0, window_bounds = array<i64: 1, 8, 1>}, {}, {pipeline_mode = #tpu.pipeline_mode<synchronous>, transform_indices = @transform_2, window_bounds = array<i64: 3, 128>}, {transform_indices = @transform_3, window_bounds = array<i64: 8, 128>}, {pipeline_mode = #tpu.pipeline_mode<synchronous>, transform_indices = @transform_4, window_bounds = array<i64: 1, 128>}, {pipeline_mode = #tpu.pipeline_mode<synchronous>, transform_indices = @transform_5, window_bounds = array<i64: 1, 128>}, {transform_indices = @transform_6, window_bounds = array<i64: 1, 8, 128>}]} {
    %c2_i32 = arith.constant 2 : i32
    %0 = arith.remsi %arg1, %c2_i32 : i32
    %c0_i32 = arith.constant 0 : i32
    %1 = arith.cmpi eq, %arg1, %c0_i32 : i32
    %2 = arith.extui %1 : i1 to i32
    %c0_i32_0 = arith.constant 0 : i32
    %3 = arith.cmpi ne, %2, %c0_i32_0 : i32
    scf.if %3 {
      %c8_i32_53 = arith.constant 8 : i32
      %102 = arith.muli %arg0, %c8_i32_53 : i32
      %c0_i32_54 = arith.constant 0 : i32
      %103 = arith.addi %102, %c0_i32_54 : i32
      %c0_i32_55 = arith.constant 0 : i32
      %104 = arith.addi %103, %c0_i32_55 : i32
      %105 = arith.index_cast %104 : i32 to index
      %106 = memref.load %arg2[%105] : memref<16xi32, #tpu.memory_space<smem>>
      %c0_i32_56 = arith.constant 0 : i32
      %c0_i32_57 = arith.constant 0 : i32
      %c0_i32_58 = arith.constant 0 : i32
      %107 = tpu.memref_slice %arg4[%106, %c0_i32_58] : memref<64x128xf32, #tpu.memory_space<any>> -> memref<1x128xf32, #tpu.memory_space<any>>
      %c0_i32_59 = arith.constant 0 : i32
      %108 = tpu.memref_slice %arg10[%c0_i32_56, %c0_i32_55, %c0_i32_59] : memref<2x8x128xf32, #tpu.memory_space<vmem>> -> memref<1x1x128xf32, #tpu.memory_space<vmem>>
      %109 = tpu.memref_squeeze %108 : memref<1x1x128xf32, #tpu.memory_space<vmem>> -> memref<1x128xf32, #tpu.memory_space<vmem>>
      %110 = tpu.memref_slice %arg11[%c0_i32_57] : memref<2x!tpu.dma_semaphore, #tpu.memory_space<semaphore_mem>> -> memref<1x!tpu.dma_semaphore, #tpu.memory_space<semaphore_mem>>
      %111 = tpu.memref_squeeze %110 : memref<1x!tpu.dma_semaphore, #tpu.memory_space<semaphore_mem>> -> memref<!tpu.dma_semaphore, #tpu.memory_space<semaphore_mem>>
      tpu.enqueue_dma source(%107 : memref<1x128xf32, #tpu.memory_space<any>>) target(%109 : memref<1x128xf32, #tpu.memory_space<vmem>>) target_semaphore(%111 : memref<!tpu.dma_semaphore, #tpu.memory_space<semaphore_mem>>)
      %c1_i32_60 = arith.constant 1 : i32
      %112 = arith.addi %103, %c1_i32_60 : i32
      %113 = arith.index_cast %112 : i32 to index
      %114 = memref.load %arg2[%113] : memref<16xi32, #tpu.memory_space<smem>>
      %c0_i32_61 = arith.constant 0 : i32
      %c0_i32_62 = arith.constant 0 : i32
      %c0_i32_63 = arith.constant 0 : i32
      %115 = tpu.memref_slice %arg4[%114, %c0_i32_63] : memref<64x128xf32, #tpu.memory_space<any>> -> memref<1x128xf32, #tpu.memory_space<any>>
      %c0_i32_64 = arith.constant 0 : i32
      %116 = tpu.memref_slice %arg10[%c0_i32_61, %c1_i32_60, %c0_i32_64] : memref<2x8x128xf32, #tpu.memory_space<vmem>> -> memref<1x1x128xf32, #tpu.memory_space<vmem>>
      %117 = tpu.memref_squeeze %116 : memref<1x1x128xf32, #tpu.memory_space<vmem>> -> memref<1x128xf32, #tpu.memory_space<vmem>>
      %118 = tpu.memref_slice %arg11[%c0_i32_62] : memref<2x!tpu.dma_semaphore, #tpu.memory_space<semaphore_mem>> -> memref<1x!tpu.dma_semaphore, #tpu.memory_space<semaphore_mem>>
      %119 = tpu.memref_squeeze %118 : memref<1x!tpu.dma_semaphore, #tpu.memory_space<semaphore_mem>> -> memref<!tpu.dma_semaphore, #tpu.memory_space<semaphore_mem>>
      tpu.enqueue_dma source(%115 : memref<1x128xf32, #tpu.memory_space<any>>) target(%117 : memref<1x128xf32, #tpu.memory_space<vmem>>) target_semaphore(%119 : memref<!tpu.dma_semaphore, #tpu.memory_space<semaphore_mem>>)
      %c2_i32_65 = arith.constant 2 : i32
      %120 = arith.addi %103, %c2_i32_65 : i32
      %121 = arith.index_cast %120 : i32 to index
      %122 = memref.load %arg2[%121] : memref<16xi32, #tpu.memory_space<smem>>
      %c0_i32_66 = arith.constant 0 : i32
      %c0_i32_67 = arith.constant 0 : i32
      %c0_i32_68 = arith.constant 0 : i32
      %123 = tpu.memref_slice %arg4[%122, %c0_i32_68] : memref<64x128xf32, #tpu.memory_space<any>> -> memref<1x128xf32, #tpu.memory_space<any>>
      %c0_i32_69 = arith.constant 0 : i32
      %124 = tpu.memref_slice %arg10[%c0_i32_66, %c2_i32_65, %c0_i32_69] : memref<2x8x128xf32, #tpu.memory_space<vmem>> -> memref<1x1x128xf32, #tpu.memory_space<vmem>>
      %125 = tpu.memref_squeeze %124 : memref<1x1x128xf32, #tpu.memory_space<vmem>> -> memref<1x128xf32, #tpu.memory_space<vmem>>
      %126 = tpu.memref_slice %arg11[%c0_i32_67] : memref<2x!tpu.dma_semaphore, #tpu.memory_space<semaphore_mem>> -> memref<1x!tpu.dma_semaphore, #tpu.memory_space<semaphore_mem>>
      %127 = tpu.memref_squeeze %126 : memref<1x!tpu.dma_semaphore, #tpu.memory_space<semaphore_mem>> -> memref<!tpu.dma_semaphore, #tpu.memory_space<semaphore_mem>>
      tpu.enqueue_dma source(%123 : memref<1x128xf32, #tpu.memory_space<any>>) target(%125 : memref<1x128xf32, #tpu.memory_space<vmem>>) target_semaphore(%127 : memref<!tpu.dma_semaphore, #tpu.memory_space<semaphore_mem>>)
      %c3_i32_70 = arith.constant 3 : i32
      %128 = arith.addi %103, %c3_i32_70 : i32
      %129 = arith.index_cast %128 : i32 to index
      %130 = memref.load %arg2[%129] : memref<16xi32, #tpu.memory_space<smem>>
      %c0_i32_71 = arith.constant 0 : i32
      %c0_i32_72 = arith.constant 0 : i32
      %c0_i32_73 = arith.constant 0 : i32
      %131 = tpu.memref_slice %arg4[%130, %c0_i32_73] : memref<64x128xf32, #tpu.memory_space<any>> -> memref<1x128xf32, #tpu.memory_space<any>>
      %c0_i32_74 = arith.constant 0 : i32
      %132 = tpu.memref_slice %arg10[%c0_i32_71, %c3_i32_70, %c0_i32_74] : memref<2x8x128xf32, #tpu.memory_space<vmem>> -> memref<1x1x128xf32, #tpu.memory_space<vmem>>
      %133 = tpu.memref_squeeze %132 : memref<1x1x128xf32, #tpu.memory_space<vmem>> -> memref<1x128xf32, #tpu.memory_space<vmem>>
      %134 = tpu.memref_slice %arg11[%c0_i32_72] : memref<2x!tpu.dma_semaphore, #tpu.memory_space<semaphore_mem>> -> memref<1x!tpu.dma_semaphore, #tpu.memory_space<semaphore_mem>>
      %135 = tpu.memref_squeeze %134 : memref<1x!tpu.dma_semaphore, #tpu.memory_space<semaphore_mem>> -> memref<!tpu.dma_semaphore, #tpu.memory_space<semaphore_mem>>
      tpu.enqueue_dma source(%131 : memref<1x128xf32, #tpu.memory_space<any>>) target(%133 : memref<1x128xf32, #tpu.memory_space<vmem>>) target_semaphore(%135 : memref<!tpu.dma_semaphore, #tpu.memory_space<semaphore_mem>>)
      %c4_i32_75 = arith.constant 4 : i32
      %136 = arith.addi %103, %c4_i32_75 : i32
      %137 = arith.index_cast %136 : i32 to index
      %138 = memref.load %arg2[%137] : memref<16xi32, #tpu.memory_space<smem>>
      %c0_i32_76 = arith.constant 0 : i32
      %c0_i32_77 = arith.constant 0 : i32
      %c0_i32_78 = arith.constant 0 : i32
      %139 = tpu.memref_slice %arg4[%138, %c0_i32_78] : memref<64x128xf32, #tpu.memory_space<any>> -> memref<1x128xf32, #tpu.memory_space<any>>
      %c0_i32_79 = arith.constant 0 : i32
      %140 = tpu.memref_slice %arg10[%c0_i32_76, %c4_i32_75, %c0_i32_79] : memref<2x8x128xf32, #tpu.memory_space<vmem>> -> memref<1x1x128xf32, #tpu.memory_space<vmem>>
      %141 = tpu.memref_squeeze %140 : memref<1x1x128xf32, #tpu.memory_space<vmem>> -> memref<1x128xf32, #tpu.memory_space<vmem>>
      %142 = tpu.memref_slice %arg11[%c0_i32_77] : memref<2x!tpu.dma_semaphore, #tpu.memory_space<semaphore_mem>> -> memref<1x!tpu.dma_semaphore, #tpu.memory_space<semaphore_mem>>
      %143 = tpu.memref_squeeze %142 : memref<1x!tpu.dma_semaphore, #tpu.memory_space<semaphore_mem>> -> memref<!tpu.dma_semaphore, #tpu.memory_space<semaphore_mem>>
      tpu.enqueue_dma source(%139 : memref<1x128xf32, #tpu.memory_space<any>>) target(%141 : memref<1x128xf32, #tpu.memory_space<vmem>>) target_semaphore(%143 : memref<!tpu.dma_semaphore, #tpu.memory_space<semaphore_mem>>)
      %c5_i32_80 = arith.constant 5 : i32
      %144 = arith.addi %103, %c5_i32_80 : i32
      %145 = arith.index_cast %144 : i32 to index
      %146 = memref.load %arg2[%145] : memref<16xi32, #tpu.memory_space<smem>>
      %c0_i32_81 = arith.constant 0 : i32
      %c0_i32_82 = arith.constant 0 : i32
      %c0_i32_83 = arith.constant 0 : i32
      %147 = tpu.memref_slice %arg4[%146, %c0_i32_83] : memref<64x128xf32, #tpu.memory_space<any>> -> memref<1x128xf32, #tpu.memory_space<any>>
      %c0_i32_84 = arith.constant 0 : i32
      %148 = tpu.memref_slice %arg10[%c0_i32_81, %c5_i32_80, %c0_i32_84] : memref<2x8x128xf32, #tpu.memory_space<vmem>> -> memref<1x1x128xf32, #tpu.memory_space<vmem>>
      %149 = tpu.memref_squeeze %148 : memref<1x1x128xf32, #tpu.memory_space<vmem>> -> memref<1x128xf32, #tpu.memory_space<vmem>>
      %150 = tpu.memref_slice %arg11[%c0_i32_82] : memref<2x!tpu.dma_semaphore, #tpu.memory_space<semaphore_mem>> -> memref<1x!tpu.dma_semaphore, #tpu.memory_space<semaphore_mem>>
      %151 = tpu.memref_squeeze %150 : memref<1x!tpu.dma_semaphore, #tpu.memory_space<semaphore_mem>> -> memref<!tpu.dma_semaphore, #tpu.memory_space<semaphore_mem>>
      tpu.enqueue_dma source(%147 : memref<1x128xf32, #tpu.memory_space<any>>) target(%149 : memref<1x128xf32, #tpu.memory_space<vmem>>) target_semaphore(%151 : memref<!tpu.dma_semaphore, #tpu.memory_space<semaphore_mem>>)
      %c6_i32_85 = arith.constant 6 : i32
      %152 = arith.addi %103, %c6_i32_85 : i32
      %153 = arith.index_cast %152 : i32 to index
      %154 = memref.load %arg2[%153] : memref<16xi32, #tpu.memory_space<smem>>
      %c0_i32_86 = arith.constant 0 : i32
      %c0_i32_87 = arith.constant 0 : i32
      %c0_i32_88 = arith.constant 0 : i32
      %155 = tpu.memref_slice %arg4[%154, %c0_i32_88] : memref<64x128xf32, #tpu.memory_space<any>> -> memref<1x128xf32, #tpu.memory_space<any>>
      %c0_i32_89 = arith.constant 0 : i32
      %156 = tpu.memref_slice %arg10[%c0_i32_86, %c6_i32_85, %c0_i32_89] : memref<2x8x128xf32, #tpu.memory_space<vmem>> -> memref<1x1x128xf32, #tpu.memory_space<vmem>>
      %157 = tpu.memref_squeeze %156 : memref<1x1x128xf32, #tpu.memory_space<vmem>> -> memref<1x128xf32, #tpu.memory_space<vmem>>
      %158 = tpu.memref_slice %arg11[%c0_i32_87] : memref<2x!tpu.dma_semaphore, #tpu.memory_space<semaphore_mem>> -> memref<1x!tpu.dma_semaphore, #tpu.memory_space<semaphore_mem>>
      %159 = tpu.memref_squeeze %158 : memref<1x!tpu.dma_semaphore, #tpu.memory_space<semaphore_mem>> -> memref<!tpu.dma_semaphore, #tpu.memory_space<semaphore_mem>>
      tpu.enqueue_dma source(%155 : memref<1x128xf32, #tpu.memory_space<any>>) target(%157 : memref<1x128xf32, #tpu.memory_space<vmem>>) target_semaphore(%159 : memref<!tpu.dma_semaphore, #tpu.memory_space<semaphore_mem>>)
      %c7_i32_90 = arith.constant 7 : i32
      %160 = arith.addi %103, %c7_i32_90 : i32
      %161 = arith.index_cast %160 : i32 to index
      %162 = memref.load %arg2[%161] : memref<16xi32, #tpu.memory_space<smem>>
      %c0_i32_91 = arith.constant 0 : i32
      %c0_i32_92 = arith.constant 0 : i32
      %c0_i32_93 = arith.constant 0 : i32
      %163 = tpu.memref_slice %arg4[%162, %c0_i32_93] : memref<64x128xf32, #tpu.memory_space<any>> -> memref<1x128xf32, #tpu.memory_space<any>>
      %c0_i32_94 = arith.constant 0 : i32
      %164 = tpu.memref_slice %arg10[%c0_i32_91, %c7_i32_90, %c0_i32_94] : memref<2x8x128xf32, #tpu.memory_space<vmem>> -> memref<1x1x128xf32, #tpu.memory_space<vmem>>
      %165 = tpu.memref_squeeze %164 : memref<1x1x128xf32, #tpu.memory_space<vmem>> -> memref<1x128xf32, #tpu.memory_space<vmem>>
      %166 = tpu.memref_slice %arg11[%c0_i32_92] : memref<2x!tpu.dma_semaphore, #tpu.memory_space<semaphore_mem>> -> memref<1x!tpu.dma_semaphore, #tpu.memory_space<semaphore_mem>>
      %167 = tpu.memref_squeeze %166 : memref<1x!tpu.dma_semaphore, #tpu.memory_space<semaphore_mem>> -> memref<!tpu.dma_semaphore, #tpu.memory_space<semaphore_mem>>
      tpu.enqueue_dma source(%163 : memref<1x128xf32, #tpu.memory_space<any>>) target(%165 : memref<1x128xf32, #tpu.memory_space<vmem>>) target_semaphore(%167 : memref<!tpu.dma_semaphore, #tpu.memory_space<semaphore_mem>>)
      %c8_i32_95 = arith.constant 8 : i32
    } else {
    }
    %c1_i32 = arith.constant 1 : i32
    %4 = arith.addi %arg1, %c1_i32 : i32
    %c1_i32_1 = arith.constant 1 : i32
    %5 = arith.cmpi slt, %4, %c1_i32_1 : i32
    %6 = arith.extui %5 : i1 to i32
    %c0_i32_2 = arith.constant 0 : i32
    %7 = arith.cmpi ne, %6, %c0_i32_2 : i32
    scf.if %7 {
      %c1_i32_53 = arith.constant 1 : i32
      %102 = arith.addi %arg1, %c1_i32_53 : i32
      %c1_i32_54 = arith.constant 1 : i32
      %103 = arith.subi %c1_i32_54, %0 : i32
      %c8_i32_55 = arith.constant 8 : i32
      %104 = arith.muli %arg0, %c8_i32_55 : i32
      %c8_i32_56 = arith.constant 8 : i32
      %105 = arith.muli %102, %c8_i32_56 : i32
      %106 = arith.addi %104, %105 : i32
      %c0_i32_57 = arith.constant 0 : i32
      %107 = arith.addi %106, %c0_i32_57 : i32
      %108 = arith.index_cast %107 : i32 to index
      %109 = memref.load %arg2[%108] : memref<16xi32, #tpu.memory_space<smem>>
      %c0_i32_58 = arith.constant 0 : i32
      %110 = tpu.memref_slice %arg4[%109, %c0_i32_58] : memref<64x128xf32, #tpu.memory_space<any>> -> memref<1x128xf32, #tpu.memory_space<any>>
      %c0_i32_59 = arith.constant 0 : i32
      %111 = tpu.memref_slice %arg10[%103, %c0_i32_57, %c0_i32_59] : memref<2x8x128xf32, #tpu.memory_space<vmem>> -> memref<1x1x128xf32, #tpu.memory_space<vmem>>
      %112 = tpu.memref_squeeze %111 : memref<1x1x128xf32, #tpu.memory_space<vmem>> -> memref<1x128xf32, #tpu.memory_space<vmem>>
      %113 = tpu.memref_slice %arg11[%103] : memref<2x!tpu.dma_semaphore, #tpu.memory_space<semaphore_mem>> -> memref<1x!tpu.dma_semaphore, #tpu.memory_space<semaphore_mem>>
      %114 = tpu.memref_squeeze %113 : memref<1x!tpu.dma_semaphore, #tpu.memory_space<semaphore_mem>> -> memref<!tpu.dma_semaphore, #tpu.memory_space<semaphore_mem>>
      tpu.enqueue_dma source(%110 : memref<1x128xf32, #tpu.memory_space<any>>) target(%112 : memref<1x128xf32, #tpu.memory_space<vmem>>) target_semaphore(%114 : memref<!tpu.dma_semaphore, #tpu.memory_space<semaphore_mem>>)
      %c1_i32_60 = arith.constant 1 : i32
      %115 = arith.addi %106, %c1_i32_60 : i32
      %116 = arith.index_cast %115 : i32 to index
      %117 = memref.load %arg2[%116] : memref<16xi32, #tpu.memory_space<smem>>
      %c0_i32_61 = arith.constant 0 : i32
      %118 = tpu.memref_slice %arg4[%117, %c0_i32_61] : memref<64x128xf32, #tpu.memory_space<any>> -> memref<1x128xf32, #tpu.memory_space<any>>
      %c0_i32_62 = arith.constant 0 : i32
      %119 = tpu.memref_slice %arg10[%103, %c1_i32_60, %c0_i32_62] : memref<2x8x128xf32, #tpu.memory_space<vmem>> -> memref<1x1x128xf32, #tpu.memory_space<vmem>>
      %120 = tpu.memref_squeeze %119 : memref<1x1x128xf32, #tpu.memory_space<vmem>> -> memref<1x128xf32, #tpu.memory_space<vmem>>
      %121 = tpu.memref_slice %arg11[%103] : memref<2x!tpu.dma_semaphore, #tpu.memory_space<semaphore_mem>> -> memref<1x!tpu.dma_semaphore, #tpu.memory_space<semaphore_mem>>
      %122 = tpu.memref_squeeze %121 : memref<1x!tpu.dma_semaphore, #tpu.memory_space<semaphore_mem>> -> memref<!tpu.dma_semaphore, #tpu.memory_space<semaphore_mem>>
      tpu.enqueue_dma source(%118 : memref<1x128xf32, #tpu.memory_space<any>>) target(%120 : memref<1x128xf32, #tpu.memory_space<vmem>>) target_semaphore(%122 : memref<!tpu.dma_semaphore, #tpu.memory_space<semaphore_mem>>)
      %c2_i32_63 = arith.constant 2 : i32
      %123 = arith.addi %106, %c2_i32_63 : i32
      %124 = arith.index_cast %123 : i32 to index
      %125 = memref.load %arg2[%124] : memref<16xi32, #tpu.memory_space<smem>>
      %c0_i32_64 = arith.constant 0 : i32
      %126 = tpu.memref_slice %arg4[%125, %c0_i32_64] : memref<64x128xf32, #tpu.memory_space<any>> -> memref<1x128xf32, #tpu.memory_space<any>>
      %c0_i32_65 = arith.constant 0 : i32
      %127 = tpu.memref_slice %arg10[%103, %c2_i32_63, %c0_i32_65] : memref<2x8x128xf32, #tpu.memory_space<vmem>> -> memref<1x1x128xf32, #tpu.memory_space<vmem>>
      %128 = tpu.memref_squeeze %127 : memref<1x1x128xf32, #tpu.memory_space<vmem>> -> memref<1x128xf32, #tpu.memory_space<vmem>>
      %129 = tpu.memref_slice %arg11[%103] : memref<2x!tpu.dma_semaphore, #tpu.memory_space<semaphore_mem>> -> memref<1x!tpu.dma_semaphore, #tpu.memory_space<semaphore_mem>>
      %130 = tpu.memref_squeeze %129 : memref<1x!tpu.dma_semaphore, #tpu.memory_space<semaphore_mem>> -> memref<!tpu.dma_semaphore, #tpu.memory_space<semaphore_mem>>
      tpu.enqueue_dma source(%126 : memref<1x128xf32, #tpu.memory_space<any>>) target(%128 : memref<1x128xf32, #tpu.memory_space<vmem>>) target_semaphore(%130 : memref<!tpu.dma_semaphore, #tpu.memory_space<semaphore_mem>>)
      %c3_i32_66 = arith.constant 3 : i32
      %131 = arith.addi %106, %c3_i32_66 : i32
      %132 = arith.index_cast %131 : i32 to index
      %133 = memref.load %arg2[%132] : memref<16xi32, #tpu.memory_space<smem>>
      %c0_i32_67 = arith.constant 0 : i32
      %134 = tpu.memref_slice %arg4[%133, %c0_i32_67] : memref<64x128xf32, #tpu.memory_space<any>> -> memref<1x128xf32, #tpu.memory_space<any>>
      %c0_i32_68 = arith.constant 0 : i32
      %135 = tpu.memref_slice %arg10[%103, %c3_i32_66, %c0_i32_68] : memref<2x8x128xf32, #tpu.memory_space<vmem>> -> memref<1x1x128xf32, #tpu.memory_space<vmem>>
      %136 = tpu.memref_squeeze %135 : memref<1x1x128xf32, #tpu.memory_space<vmem>> -> memref<1x128xf32, #tpu.memory_space<vmem>>
      %137 = tpu.memref_slice %arg11[%103] : memref<2x!tpu.dma_semaphore, #tpu.memory_space<semaphore_mem>> -> memref<1x!tpu.dma_semaphore, #tpu.memory_space<semaphore_mem>>
      %138 = tpu.memref_squeeze %137 : memref<1x!tpu.dma_semaphore, #tpu.memory_space<semaphore_mem>> -> memref<!tpu.dma_semaphore, #tpu.memory_space<semaphore_mem>>
      tpu.enqueue_dma source(%134 : memref<1x128xf32, #tpu.memory_space<any>>) target(%136 : memref<1x128xf32, #tpu.memory_space<vmem>>) target_semaphore(%138 : memref<!tpu.dma_semaphore, #tpu.memory_space<semaphore_mem>>)
      %c4_i32_69 = arith.constant 4 : i32
      %139 = arith.addi %106, %c4_i32_69 : i32
      %140 = arith.index_cast %139 : i32 to index
      %141 = memref.load %arg2[%140] : memref<16xi32, #tpu.memory_space<smem>>
      %c0_i32_70 = arith.constant 0 : i32
      %142 = tpu.memref_slice %arg4[%141, %c0_i32_70] : memref<64x128xf32, #tpu.memory_space<any>> -> memref<1x128xf32, #tpu.memory_space<any>>
      %c0_i32_71 = arith.constant 0 : i32
      %143 = tpu.memref_slice %arg10[%103, %c4_i32_69, %c0_i32_71] : memref<2x8x128xf32, #tpu.memory_space<vmem>> -> memref<1x1x128xf32, #tpu.memory_space<vmem>>
      %144 = tpu.memref_squeeze %143 : memref<1x1x128xf32, #tpu.memory_space<vmem>> -> memref<1x128xf32, #tpu.memory_space<vmem>>
      %145 = tpu.memref_slice %arg11[%103] : memref<2x!tpu.dma_semaphore, #tpu.memory_space<semaphore_mem>> -> memref<1x!tpu.dma_semaphore, #tpu.memory_space<semaphore_mem>>
      %146 = tpu.memref_squeeze %145 : memref<1x!tpu.dma_semaphore, #tpu.memory_space<semaphore_mem>> -> memref<!tpu.dma_semaphore, #tpu.memory_space<semaphore_mem>>
      tpu.enqueue_dma source(%142 : memref<1x128xf32, #tpu.memory_space<any>>) target(%144 : memref<1x128xf32, #tpu.memory_space<vmem>>) target_semaphore(%146 : memref<!tpu.dma_semaphore, #tpu.memory_space<semaphore_mem>>)
      %c5_i32_72 = arith.constant 5 : i32
      %147 = arith.addi %106, %c5_i32_72 : i32
      %148 = arith.index_cast %147 : i32 to index
      %149 = memref.load %arg2[%148] : memref<16xi32, #tpu.memory_space<smem>>
      %c0_i32_73 = arith.constant 0 : i32
      %150 = tpu.memref_slice %arg4[%149, %c0_i32_73] : memref<64x128xf32, #tpu.memory_space<any>> -> memref<1x128xf32, #tpu.memory_space<any>>
      %c0_i32_74 = arith.constant 0 : i32
      %151 = tpu.memref_slice %arg10[%103, %c5_i32_72, %c0_i32_74] : memref<2x8x128xf32, #tpu.memory_space<vmem>> -> memref<1x1x128xf32, #tpu.memory_space<vmem>>
      %152 = tpu.memref_squeeze %151 : memref<1x1x128xf32, #tpu.memory_space<vmem>> -> memref<1x128xf32, #tpu.memory_space<vmem>>
      %153 = tpu.memref_slice %arg11[%103] : memref<2x!tpu.dma_semaphore, #tpu.memory_space<semaphore_mem>> -> memref<1x!tpu.dma_semaphore, #tpu.memory_space<semaphore_mem>>
      %154 = tpu.memref_squeeze %153 : memref<1x!tpu.dma_semaphore, #tpu.memory_space<semaphore_mem>> -> memref<!tpu.dma_semaphore, #tpu.memory_space<semaphore_mem>>
      tpu.enqueue_dma source(%150 : memref<1x128xf32, #tpu.memory_space<any>>) target(%152 : memref<1x128xf32, #tpu.memory_space<vmem>>) target_semaphore(%154 : memref<!tpu.dma_semaphore, #tpu.memory_space<semaphore_mem>>)
      %c6_i32_75 = arith.constant 6 : i32
      %155 = arith.addi %106, %c6_i32_75 : i32
      %156 = arith.index_cast %155 : i32 to index
      %157 = memref.load %arg2[%156] : memref<16xi32, #tpu.memory_space<smem>>
      %c0_i32_76 = arith.constant 0 : i32
      %158 = tpu.memref_slice %arg4[%157, %c0_i32_76] : memref<64x128xf32, #tpu.memory_space<any>> -> memref<1x128xf32, #tpu.memory_space<any>>
      %c0_i32_77 = arith.constant 0 : i32
      %159 = tpu.memref_slice %arg10[%103, %c6_i32_75, %c0_i32_77] : memref<2x8x128xf32, #tpu.memory_space<vmem>> -> memref<1x1x128xf32, #tpu.memory_space<vmem>>
      %160 = tpu.memref_squeeze %159 : memref<1x1x128xf32, #tpu.memory_space<vmem>> -> memref<1x128xf32, #tpu.memory_space<vmem>>
      %161 = tpu.memref_slice %arg11[%103] : memref<2x!tpu.dma_semaphore, #tpu.memory_space<semaphore_mem>> -> memref<1x!tpu.dma_semaphore, #tpu.memory_space<semaphore_mem>>
      %162 = tpu.memref_squeeze %161 : memref<1x!tpu.dma_semaphore, #tpu.memory_space<semaphore_mem>> -> memref<!tpu.dma_semaphore, #tpu.memory_space<semaphore_mem>>
      tpu.enqueue_dma source(%158 : memref<1x128xf32, #tpu.memory_space<any>>) target(%160 : memref<1x128xf32, #tpu.memory_space<vmem>>) target_semaphore(%162 : memref<!tpu.dma_semaphore, #tpu.memory_space<semaphore_mem>>)
      %c7_i32_78 = arith.constant 7 : i32
      %163 = arith.addi %106, %c7_i32_78 : i32
      %164 = arith.index_cast %163 : i32 to index
      %165 = memref.load %arg2[%164] : memref<16xi32, #tpu.memory_space<smem>>
      %c0_i32_79 = arith.constant 0 : i32
      %166 = tpu.memref_slice %arg4[%165, %c0_i32_79] : memref<64x128xf32, #tpu.memory_space<any>> -> memref<1x128xf32, #tpu.memory_space<any>>
      %c0_i32_80 = arith.constant 0 : i32
      %167 = tpu.memref_slice %arg10[%103, %c7_i32_78, %c0_i32_80] : memref<2x8x128xf32, #tpu.memory_space<vmem>> -> memref<1x1x128xf32, #tpu.memory_space<vmem>>
      %168 = tpu.memref_squeeze %167 : memref<1x1x128xf32, #tpu.memory_space<vmem>> -> memref<1x128xf32, #tpu.memory_space<vmem>>
      %169 = tpu.memref_slice %arg11[%103] : memref<2x!tpu.dma_semaphore, #tpu.memory_space<semaphore_mem>> -> memref<1x!tpu.dma_semaphore, #tpu.memory_space<semaphore_mem>>
      %170 = tpu.memref_squeeze %169 : memref<1x!tpu.dma_semaphore, #tpu.memory_space<semaphore_mem>> -> memref<!tpu.dma_semaphore, #tpu.memory_space<semaphore_mem>>
      tpu.enqueue_dma source(%166 : memref<1x128xf32, #tpu.memory_space<any>>) target(%168 : memref<1x128xf32, #tpu.memory_space<vmem>>) target_semaphore(%170 : memref<!tpu.dma_semaphore, #tpu.memory_space<semaphore_mem>>)
      %c8_i32_81 = arith.constant 8 : i32
    } else {
    }
    %c0_i32_3 = arith.constant 0 : i32
    %c0_i32_4 = arith.constant 0 : i32
    %c0_i32_5 = arith.constant 0 : i32
    %8 = tpu.memref_slice %arg4[%c0_i32_4, %c0_i32_5] : memref<64x128xf32, #tpu.memory_space<any>> -> memref<1x128xf32, #tpu.memory_space<any>>
    %c0_i32_6 = arith.constant 0 : i32
    %9 = tpu.memref_slice %arg10[%0, %c0_i32_3, %c0_i32_6] : memref<2x8x128xf32, #tpu.memory_space<vmem>> -> memref<1x1x128xf32, #tpu.memory_space<vmem>>
    %10 = tpu.memref_squeeze %9 : memref<1x1x128xf32, #tpu.memory_space<vmem>> -> memref<1x128xf32, #tpu.memory_space<vmem>>
    %11 = tpu.memref_slice %arg11[%0] : memref<2x!tpu.dma_semaphore, #tpu.memory_space<semaphore_mem>> -> memref<1x!tpu.dma_semaphore, #tpu.memory_space<semaphore_mem>>
    %12 = tpu.memref_squeeze %11 : memref<1x!tpu.dma_semaphore, #tpu.memory_space<semaphore_mem>> -> memref<!tpu.dma_semaphore, #tpu.memory_space<semaphore_mem>>
    tpu.wait_dma2 semaphore(%12 : memref<!tpu.dma_semaphore, #tpu.memory_space<semaphore_mem>>) src(%8 : memref<1x128xf32, #tpu.memory_space<any>>) dst(%10 : memref<1x128xf32, #tpu.memory_space<vmem>>)
    %c1_i32_7 = arith.constant 1 : i32
    %c0_i32_8 = arith.constant 0 : i32
    %c0_i32_9 = arith.constant 0 : i32
    %13 = tpu.memref_slice %arg4[%c0_i32_8, %c0_i32_9] : memref<64x128xf32, #tpu.memory_space<any>> -> memref<1x128xf32, #tpu.memory_space<any>>
    %c0_i32_10 = arith.constant 0 : i32
    %14 = tpu.memref_slice %arg10[%0, %c1_i32_7, %c0_i32_10] : memref<2x8x128xf32, #tpu.memory_space<vmem>> -> memref<1x1x128xf32, #tpu.memory_space<vmem>>
    %15 = tpu.memref_squeeze %14 : memref<1x1x128xf32, #tpu.memory_space<vmem>> -> memref<1x128xf32, #tpu.memory_space<vmem>>
    %16 = tpu.memref_slice %arg11[%0] : memref<2x!tpu.dma_semaphore, #tpu.memory_space<semaphore_mem>> -> memref<1x!tpu.dma_semaphore, #tpu.memory_space<semaphore_mem>>
    %17 = tpu.memref_squeeze %16 : memref<1x!tpu.dma_semaphore, #tpu.memory_space<semaphore_mem>> -> memref<!tpu.dma_semaphore, #tpu.memory_space<semaphore_mem>>
    tpu.wait_dma2 semaphore(%17 : memref<!tpu.dma_semaphore, #tpu.memory_space<semaphore_mem>>) src(%13 : memref<1x128xf32, #tpu.memory_space<any>>) dst(%15 : memref<1x128xf32, #tpu.memory_space<vmem>>)
    %c2_i32_11 = arith.constant 2 : i32
    %c0_i32_12 = arith.constant 0 : i32
    %c0_i32_13 = arith.constant 0 : i32
    %18 = tpu.memref_slice %arg4[%c0_i32_12, %c0_i32_13] : memref<64x128xf32, #tpu.memory_space<any>> -> memref<1x128xf32, #tpu.memory_space<any>>
    %c0_i32_14 = arith.constant 0 : i32
    %19 = tpu.memref_slice %arg10[%0, %c2_i32_11, %c0_i32_14] : memref<2x8x128xf32, #tpu.memory_space<vmem>> -> memref<1x1x128xf32, #tpu.memory_space<vmem>>
    %20 = tpu.memref_squeeze %19 : memref<1x1x128xf32, #tpu.memory_space<vmem>> -> memref<1x128xf32, #tpu.memory_space<vmem>>
    %21 = tpu.memref_slice %arg11[%0] : memref<2x!tpu.dma_semaphore, #tpu.memory_space<semaphore_mem>> -> memref<1x!tpu.dma_semaphore, #tpu.memory_space<semaphore_mem>>
    %22 = tpu.memref_squeeze %21 : memref<1x!tpu.dma_semaphore, #tpu.memory_space<semaphore_mem>> -> memref<!tpu.dma_semaphore, #tpu.memory_space<semaphore_mem>>
    tpu.wait_dma2 semaphore(%22 : memref<!tpu.dma_semaphore, #tpu.memory_space<semaphore_mem>>) src(%18 : memref<1x128xf32, #tpu.memory_space<any>>) dst(%20 : memref<1x128xf32, #tpu.memory_space<vmem>>)
    %c3_i32 = arith.constant 3 : i32
    %c0_i32_15 = arith.constant 0 : i32
    %c0_i32_16 = arith.constant 0 : i32
    %23 = tpu.memref_slice %arg4[%c0_i32_15, %c0_i32_16] : memref<64x128xf32, #tpu.memory_space<any>> -> memref<1x128xf32, #tpu.memory_space<any>>
    %c0_i32_17 = arith.constant 0 : i32
    %24 = tpu.memref_slice %arg10[%0, %c3_i32, %c0_i32_17] : memref<2x8x128xf32, #tpu.memory_space<vmem>> -> memref<1x1x128xf32, #tpu.memory_space<vmem>>
    %25 = tpu.memref_squeeze %24 : memref<1x1x128xf32, #tpu.memory_space<vmem>> -> memref<1x128xf32, #tpu.memory_space<vmem>>
    %26 = tpu.memref_slice %arg11[%0] : memref<2x!tpu.dma_semaphore, #tpu.memory_space<semaphore_mem>> -> memref<1x!tpu.dma_semaphore, #tpu.memory_space<semaphore_mem>>
    %27 = tpu.memref_squeeze %26 : memref<1x!tpu.dma_semaphore, #tpu.memory_space<semaphore_mem>> -> memref<!tpu.dma_semaphore, #tpu.memory_space<semaphore_mem>>
    tpu.wait_dma2 semaphore(%27 : memref<!tpu.dma_semaphore, #tpu.memory_space<semaphore_mem>>) src(%23 : memref<1x128xf32, #tpu.memory_space<any>>) dst(%25 : memref<1x128xf32, #tpu.memory_space<vmem>>)
    %c4_i32 = arith.constant 4 : i32
    %c0_i32_18 = arith.constant 0 : i32
    %c0_i32_19 = arith.constant 0 : i32
    %28 = tpu.memref_slice %arg4[%c0_i32_18, %c0_i32_19] : memref<64x128xf32, #tpu.memory_space<any>> -> memref<1x128xf32, #tpu.memory_space<any>>
    %c0_i32_20 = arith.constant 0 : i32
    %29 = tpu.memref_slice %arg10[%0, %c4_i32, %c0_i32_20] : memref<2x8x128xf32, #tpu.memory_space<vmem>> -> memref<1x1x128xf32, #tpu.memory_space<vmem>>
    %30 = tpu.memref_squeeze %29 : memref<1x1x128xf32, #tpu.memory_space<vmem>> -> memref<1x128xf32, #tpu.memory_space<vmem>>
    %31 = tpu.memref_slice %arg11[%0] : memref<2x!tpu.dma_semaphore, #tpu.memory_space<semaphore_mem>> -> memref<1x!tpu.dma_semaphore, #tpu.memory_space<semaphore_mem>>
    %32 = tpu.memref_squeeze %31 : memref<1x!tpu.dma_semaphore, #tpu.memory_space<semaphore_mem>> -> memref<!tpu.dma_semaphore, #tpu.memory_space<semaphore_mem>>
    tpu.wait_dma2 semaphore(%32 : memref<!tpu.dma_semaphore, #tpu.memory_space<semaphore_mem>>) src(%28 : memref<1x128xf32, #tpu.memory_space<any>>) dst(%30 : memref<1x128xf32, #tpu.memory_space<vmem>>)
    %c5_i32 = arith.constant 5 : i32
    %c0_i32_21 = arith.constant 0 : i32
    %c0_i32_22 = arith.constant 0 : i32
    %33 = tpu.memref_slice %arg4[%c0_i32_21, %c0_i32_22] : memref<64x128xf32, #tpu.memory_space<any>> -> memref<1x128xf32, #tpu.memory_space<any>>
    %c0_i32_23 = arith.constant 0 : i32
    %34 = tpu.memref_slice %arg10[%0, %c5_i32, %c0_i32_23] : memref<2x8x128xf32, #tpu.memory_space<vmem>> -> memref<1x1x128xf32, #tpu.memory_space<vmem>>
    %35 = tpu.memref_squeeze %34 : memref<1x1x128xf32, #tpu.memory_space<vmem>> -> memref<1x128xf32, #tpu.memory_space<vmem>>
    %36 = tpu.memref_slice %arg11[%0] : memref<2x!tpu.dma_semaphore, #tpu.memory_space<semaphore_mem>> -> memref<1x!tpu.dma_semaphore, #tpu.memory_space<semaphore_mem>>
    %37 = tpu.memref_squeeze %36 : memref<1x!tpu.dma_semaphore, #tpu.memory_space<semaphore_mem>> -> memref<!tpu.dma_semaphore, #tpu.memory_space<semaphore_mem>>
    tpu.wait_dma2 semaphore(%37 : memref<!tpu.dma_semaphore, #tpu.memory_space<semaphore_mem>>) src(%33 : memref<1x128xf32, #tpu.memory_space<any>>) dst(%35 : memref<1x128xf32, #tpu.memory_space<vmem>>)
    %c6_i32 = arith.constant 6 : i32
    %c0_i32_24 = arith.constant 0 : i32
    %c0_i32_25 = arith.constant 0 : i32
    %38 = tpu.memref_slice %arg4[%c0_i32_24, %c0_i32_25] : memref<64x128xf32, #tpu.memory_space<any>> -> memref<1x128xf32, #tpu.memory_space<any>>
    %c0_i32_26 = arith.constant 0 : i32
    %39 = tpu.memref_slice %arg10[%0, %c6_i32, %c0_i32_26] : memref<2x8x128xf32, #tpu.memory_space<vmem>> -> memref<1x1x128xf32, #tpu.memory_space<vmem>>
    %40 = tpu.memref_squeeze %39 : memref<1x1x128xf32, #tpu.memory_space<vmem>> -> memref<1x128xf32, #tpu.memory_space<vmem>>
    %41 = tpu.memref_slice %arg11[%0] : memref<2x!tpu.dma_semaphore, #tpu.memory_space<semaphore_mem>> -> memref<1x!tpu.dma_semaphore, #tpu.memory_space<semaphore_mem>>
    %42 = tpu.memref_squeeze %41 : memref<1x!tpu.dma_semaphore, #tpu.memory_space<semaphore_mem>> -> memref<!tpu.dma_semaphore, #tpu.memory_space<semaphore_mem>>
    tpu.wait_dma2 semaphore(%42 : memref<!tpu.dma_semaphore, #tpu.memory_space<semaphore_mem>>) src(%38 : memref<1x128xf32, #tpu.memory_space<any>>) dst(%40 : memref<1x128xf32, #tpu.memory_space<vmem>>)
    %c7_i32 = arith.constant 7 : i32
    %c0_i32_27 = arith.constant 0 : i32
    %c0_i32_28 = arith.constant 0 : i32
    %43 = tpu.memref_slice %arg4[%c0_i32_27, %c0_i32_28] : memref<64x128xf32, #tpu.memory_space<any>> -> memref<1x128xf32, #tpu.memory_space<any>>
    %c0_i32_29 = arith.constant 0 : i32
    %44 = tpu.memref_slice %arg10[%0, %c7_i32, %c0_i32_29] : memref<2x8x128xf32, #tpu.memory_space<vmem>> -> memref<1x1x128xf32, #tpu.memory_space<vmem>>
    %45 = tpu.memref_squeeze %44 : memref<1x1x128xf32, #tpu.memory_space<vmem>> -> memref<1x128xf32, #tpu.memory_space<vmem>>
    %46 = tpu.memref_slice %arg11[%0] : memref<2x!tpu.dma_semaphore, #tpu.memory_space<semaphore_mem>> -> memref<1x!tpu.dma_semaphore, #tpu.memory_space<semaphore_mem>>
    %47 = tpu.memref_squeeze %46 : memref<1x!tpu.dma_semaphore, #tpu.memory_space<semaphore_mem>> -> memref<!tpu.dma_semaphore, #tpu.memory_space<semaphore_mem>>
    tpu.wait_dma2 semaphore(%47 : memref<!tpu.dma_semaphore, #tpu.memory_space<semaphore_mem>>) src(%43 : memref<1x128xf32, #tpu.memory_space<any>>) dst(%45 : memref<1x128xf32, #tpu.memory_space<vmem>>)
    %c8_i32 = arith.constant 8 : i32
    %48 = arith.index_cast %0 : i32 to index
    %c0 = arith.constant 0 : index
    %c0_30 = arith.constant 0 : index
    %49 = vector.load %arg10[%48, %c0, %c0_30] : memref<2x8x128xf32, #tpu.memory_space<vmem>>, vector<1x8x128xf32>
    %50 = vector.shape_cast %49 : vector<1x8x128xf32> to vector<8x128xf32>
    %c0_31 = arith.constant 0 : index
    %c0_32 = arith.constant 0 : index
    %c0_33 = arith.constant 0 : index
    %51 = vector.load %arg3[%c0_31, %c0_32, %c0_33] : memref<1x8x1xi32, #tpu.memory_space<vmem>>, vector<1x8x1xi32>
    %52 = vector.shape_cast %51 : vector<1x8x1xi32> to vector<8x1xi32>
    %c0_i32_34 = arith.constant 0 : i32
    %53 = vector.broadcast %c0_i32_34 : i32 to vector<8x1xi32>
    %54 = arith.cmpi eq, %52, %53 : vector<8x1xi32>
    %c0_35 = arith.constant 0 : index
    %c0_36 = arith.constant 0 : index
    %55 = vector.load %arg5[%c0_35, %c0_36] : memref<3x128xf32, #tpu.memory_space<vmem>>, vector<1x128xf32>
    %c1_i32_37 = arith.constant 1 : i32
    %56 = vector.broadcast %c1_i32_37 : i32 to vector<8x1xi32>
    %57 = arith.cmpi eq, %52, %56 : vector<8x1xi32>
    %c1 = arith.constant 1 : index
    %c0_38 = arith.constant 0 : index
    %58 = vector.load %arg5[%c1, %c0_38] : memref<3x128xf32, #tpu.memory_space<vmem>>, vector<1x128xf32>
    %c2 = arith.constant 2 : index
    %c0_39 = arith.constant 0 : index
    %59 = vector.load %arg5[%c2, %c0_39] : memref<3x128xf32, #tpu.memory_space<vmem>>, vector<1x128xf32>
    %60 = vector.shape_cast %57 : vector<8x1xi1> to vector<8x1xi1>
    %61 = vector.broadcast %60 : vector<8x1xi1> to vector<8x128xi1>
    %62 = vector.shape_cast %58 : vector<1x128xf32> to vector<1x128xf32>
    %63 = vector.broadcast %62 : vector<1x128xf32> to vector<8x128xf32>
    %64 = vector.shape_cast %59 : vector<1x128xf32> to vector<1x128xf32>
    %65 = vector.broadcast %64 : vector<1x128xf32> to vector<8x128xf32>
    %66 = arith.select %61, %63, %65 : vector<8x128xi1>, vector<8x128xf32>
    %67 = vector.shape_cast %54 : vector<8x1xi1> to vector<8x1xi1>
    %68 = vector.broadcast %67 : vector<8x1xi1> to vector<8x128xi1>
    %69 = vector.shape_cast %55 : vector<1x128xf32> to vector<1x128xf32>
    %70 = vector.broadcast %69 : vector<1x128xf32> to vector<8x128xf32>
    %71 = arith.select %68, %70, %66 : vector<8x128xi1>, vector<8x128xf32>
    %72 = arith.addf %50, %71 : vector<8x128xf32>
    %c0_40 = arith.constant 0 : index
    %c0_41 = arith.constant 0 : index
    %73 = vector.load %arg6[%c0_40, %c0_41] : memref<8x128xf32, #tpu.memory_space<vmem>>, vector<8x128xf32>
    %74 = arith.addf %72, %73 : vector<8x128xf32>
    %cst = arith.constant dense<0.000000e+00> : vector<8xf32>
    %75 = vector.multi_reduction <add>, %74, %cst [1] : vector<8x128xf32> to vector<8xf32>
    %76 = vector.shape_cast %75 : vector<8xf32> to vector<8x1xf32>
    %cst_42 = arith.constant 1.280000e+02 : f32
    %77 = vector.broadcast %cst_42 : f32 to vector<8x1xf32>
    %78 = arith.divf %76, %77 : vector<8x1xf32>
    %79 = vector.broadcast %78 : vector<8x1xf32> to vector<8x128xf32>
    %80 = arith.subf %74, %79 : vector<8x128xf32>
    %81 = arith.mulf %80, %80 : vector<8x128xf32>
    %cst_43 = arith.constant dense<0.000000e+00> : vector<8xf32>
    %82 = vector.multi_reduction <add>, %81, %cst_43 [1] : vector<8x128xf32> to vector<8xf32>
    %83 = vector.shape_cast %82 : vector<8xf32> to vector<8x1xf32>
    %cst_44 = arith.constant 1.280000e+02 : f32
    %84 = vector.broadcast %cst_44 : f32 to vector<8x1xf32>
    %85 = arith.divf %83, %84 : vector<8x1xf32>
    %86 = vector.broadcast %78 : vector<8x1xf32> to vector<8x128xf32>
    %87 = arith.subf %74, %86 : vector<8x128xf32>
    %cst_45 = arith.constant 9.99999974E-6 : f32
    %88 = vector.broadcast %cst_45 : f32 to vector<8x1xf32>
    %89 = arith.addf %85, %88 : vector<8x1xf32>
    %90 = math.rsqrt %89 : vector<8x1xf32>
    %91 = vector.broadcast %90 : vector<8x1xf32> to vector<8x128xf32>
    %92 = arith.mulf %87, %91 : vector<8x128xf32>
    %c0_46 = arith.constant 0 : index
    %c0_47 = arith.constant 0 : index
    %93 = vector.load %arg7[%c0_46, %c0_47] : memref<1x128xf32, #tpu.memory_space<vmem>>, vector<1x128xf32>
    %94 = vector.broadcast %93 : vector<1x128xf32> to vector<8x128xf32>
    %95 = arith.mulf %92, %94 : vector<8x128xf32>
    %c0_48 = arith.constant 0 : index
    %c0_49 = arith.constant 0 : index
    %96 = vector.load %arg8[%c0_48, %c0_49] : memref<1x128xf32, #tpu.memory_space<vmem>>, vector<1x128xf32>
    %97 = vector.broadcast %96 : vector<1x128xf32> to vector<8x128xf32>
    %98 = arith.addf %95, %97 : vector<8x128xf32>
    %c0_50 = arith.constant 0 : index
    %c0_51 = arith.constant 0 : index
    %c0_52 = arith.constant 0 : index
    %99 = vector.load %arg9[%c0_50, %c0_51, %c0_52] : memref<1x8x128xf32, #tpu.memory_space<vmem>>, vector<1x8x128xf32>
    %100 = vector.shape_cast %99 : vector<1x8x128xf32> to vector<8x128xf32>
    %101 = vector.shape_cast %98 : vector<8x128xf32> to vector<1x8x128xf32>
    tpu.vector_store %arg9[%c0_50, %c0_51, %c0_52], %101 {strides = array<i32>} : memref<1x8x128xf32, #tpu.memory_space<vmem>>, vector<1x8x128xf32>,
    return
  }
  func.func @transform_0(%arg0: i32, %arg1: i32, %arg2: memref<16xi32, #tpu.memory_space<smem>>) -> (i32, i32, i32) {
    %c0_i32 = arith.constant 0 : i32
    %c0_i32_0 = arith.constant 0 : i32
    return %arg0, %arg1, %c0_i32 : i32, i32, i32
  }
  func.func @transform_2(%arg0: i32, %arg1: i32, %arg2: memref<16xi32, #tpu.memory_space<smem>>) -> (i32, i32) {
    %c0_i32 = arith.constant 0 : i32
    %c0_i32_0 = arith.constant 0 : i32
    %c0_i32_1 = arith.constant 0 : i32
    return %c0_i32, %c0_i32_0 : i32, i32
  }
  func.func @transform_3(%arg0: i32, %arg1: i32, %arg2: memref<16xi32, #tpu.memory_space<smem>>) -> (i32, i32) {
    %c0_i32 = arith.constant 0 : i32
    %c0_i32_0 = arith.constant 0 : i32
    return %arg1, %c0_i32 : i32, i32
  }
  func.func @transform_4(%arg0: i32, %arg1: i32, %arg2: memref<16xi32, #tpu.memory_space<smem>>) -> (i32, i32) {
    %c0_i32 = arith.constant 0 : i32
    %c0_i32_0 = arith.constant 0 : i32
    %c0_i32_1 = arith.constant 0 : i32
    return %c0_i32, %c0_i32_0 : i32, i32
  }
  func.func @transform_5(%arg0: i32, %arg1: i32, %arg2: memref<16xi32, #tpu.memory_space<smem>>) -> (i32, i32) {
    %c0_i32 = arith.constant 0 : i32
    %c0_i32_0 = arith.constant 0 : i32
    %c0_i32_1 = arith.constant 0 : i32
    return %c0_i32, %c0_i32_0 : i32, i32
  }
  func.func @transform_6(%arg0: i32, %arg1: i32, %arg2: memref<16xi32, #tpu.memory_space<smem>>) -> (i32, i32, i32) {
    %c0_i32 = arith.constant 0 : i32
    %c0_i32_0 = arith.constant 0 : i32
    return %arg0, %arg1, %c0_i32 : i32, i32, i32
  }
}

</mosaic_0001>

<bundles_post_ra>
// kernel: tpu_custom_call.1
= control target key start
LH: loop header
LB: loop body
LE: loop exit
PB: predicated region body
PF: predicated region fallthrough
CT: control target
= control target key end

     0   :  { %s1511_s0 = inlined_call_operand.vmem [shape: s32[16], index: 0, kind: input, shape index: {}]   ;;  %s1512_s1 = inlined_call_operand.vmem [shape: s32[2,8,1], index: 1, kind: input, shape index: {}]   ;;  %s1513_s2 = inlined_call_operand.hbm [shape: f32[64,128], index: 2, kind: input, shape index: {}]   ;;  %s1514_s3 = inlined_call_operand.vmem [shape: f32[3,128], index: 3, kind: input, shape index: {}]   ;;  %s1515_s4 = inlined_call_operand.vmem [shape: f32[8,128], index: 4, kind: input, shape index: {}]   ;;  %s1516_s5 = inlined_call_operand.vmem [shape: f32[1,128], index: 5, kind: input, shape index: {}]   ;;  %s1517_s6 = inlined_call_operand.vmem [shape: f32[1,128], index: 6, kind: input, shape index: {}]   ;;  %s1518_s7 = inlined_call_operand.hbm [shape: f32[2,8,128], index: 7, kind: output, shape index: {}]  }
   0x1   :  { %1528 = sst [smem:[#allocation52_spill]] %s1512_s1  ;;  %s12_s26 = sshll.u32 %s1511_s0, 4  ;;  %s13_s26 = int_to_ptr.vmem [resolvable:$true] %s12_s26 }
   0x2   :  { %1529 = sst [smem:[#allocation53_spill]] %s1518_s7  ;;  %s920_s27 = scalar_lea.vmem %s13_s26, 16 }
   0x3   :  { %p921_p0 = scmp.ne.s32.totalorder %s13_s26, %s920_s27  ;;  %p925_p1 = scmp.lt.s32.totalorder %s13_s26, %s13_s26 }
   0x4   :  { %p926_p2 = scmp.lt.s32.totalorder %s920_s27, %s920_s27 }
   0x6   :  { %p927_p3 = por %p926_p2, %p925_p1 }
   0x8   :  { %p928_p4 = pnand %p927_p3, %p921_p0 }
   0xa   :  { %931 = shalt.err (!%p928_p4)  }
   0xb   :  { %s1190_s28 = smov [#allocation5]  }
   0xc   :  { %15 = dma.vmem_to_smem %s13_s26, 16, %s1190_s28, [#allocation4] }
   0xd   :  { %1158 = dma.done.wait [#allocation4], 16 }
   0xe   :  { %1159 = vsyncadd [#allocation4], 4294967280 }
   0xf   :  { %17 = sfence }
  0x10   :  { %18 = vsyncpa [#allocation7], 0 }
  0x11   :  { %20 = vsyncpa [#allocation7 + $0x1], 0  ;;  %s1244_s29 = smov 0   ;;  %s1246_s30 = smov 0  }
  0x12   :  { %s1248_s0 = smov 0   ;;  %s1250_s8 = smov 0  }
  0x13   :  { %s1252_s9 = smov 0   ;;  %s1254_s10 = smov 0  }
  0x14 LB: > { %1530 = sst [smem:[#allocation45_spill]] %s1168_s29  ;;  %s808_s11 = sadd.s32 4294967295, %s1188_s10   ;;  %s1188_s10 = sphi %s1254_s10, %s26_s10   ;;  %s1184_s9 = sphi %s1252_s9, %s1549_s9   ;;  %s1180_s8 = sphi %s1250_s8, %s1548_s8   ;;  %s1176_s0 = sphi %s1248_s0, %s1547_s0   ;;  %s1172_s30 = sphi %s1246_s30, %s1551_s30   ;;  %s1168_s29 = sphi %s1244_s29, %s1550_s29  }
  0x15   : > { %1531 = sst [smem:[#allocation46_spill]] %s1176_s0  ;;  %s809_s12 = sadd.s32 4294967294, %s1188_s10  }
  0x16   : > { %1532 = sst [smem:[#allocation47_spill]] %s1184_s9  ;;  %s38_s13 = sadd.s32 1, %s1184_s9 }
  0x17   : > { %1533 = sst [smem:[#allocation48_spill]] %s1188_s10  ;;  %s164_s14 = sadd.s32 1, %s1176_s0 }
  0x18   : > { %p40_p5 = scmp.ge.s32.totalorder %s38_s13, 2  ;;  %p174_p6 = scmp.ne.s32.totalorder %s1176_s0, %s1172_s30 }
  0x19   : > { %p175_p7 = scmp.eq.s32.totalorder %s808_s11, 1  ;;  %p180_p8 = scmp.ne.s32.totalorder %s1172_s30, %s1168_s29 }
  0x1a   : > { %s1553_s13 = smov (%p40_p5, %s38_s13), 0  ;;  %p181_p10 = scmp.eq.s32.totalorder %s809_s12, 1 }
  0x1b   : > { %1534 = sst [smem:[#allocation49_spill]] %s1553_s13  ;;  %p1284_p9 = por %p175_p7, %p174_p6 }
  0x1c   : > { %s159_s16 = ssub.s32 %s1184_s9, %s1553_s13  ;;  %p813_p11 = scmp.ge.s32.totalorder %s1188_s10, 1 }
  0x1d   : > { %p162_p12 = scmp.eq.s32.totalorder %s159_s16, 0  ;;  %p1291_p13 = por %p181_p10, %p180_p8 }
  0x1e   : > { %p225_p0 = scmp.lt.s32.totalorder %s1188_s10, 3 }
  0x1f   : > { %s1536_s17 = scalar_select %p1291_p13, 1, 0 }
  0x20   : > { %s1297_s18 = scalar_select %p162_p12, %s1176_s0, %s164_s14  }
  0x21   : > { %1537 = sst [smem:[#allocation50_spill]] %s1536_s17  ;;  %p226_p1 = pnand %p813_p11, %p225_p0 }
  0x22   : > { %1538 = sst [smem:[#allocation51_spill]] %s1297_s18  ;;  %s1519_s19 = sand.u32 (!%p226_p1), 1, %s1172_s30  }
  0x23   : > { %229 = sbr.rel (%p226_p1) target bundleno = 664 (0x298), region = 40  ;;  %p259_p2 = scmp.lt.s32.totalorder (!%p226_p1), %s1180_s8, 1 }
  0x24   : > { %s1303_s20 = sshll.u32 (!%p226_p1), %s1519_s19, 3  ;;  %s1306_s21 = sshll.u32 (!%p226_p1), %s1180_s8, 3 }
  0x25   : > { %s281_s22 = sld [smem:[#allocation5 + %s1306_s21]] (!%p226_p1)  ;;  %s295_s24 = sadd.s32 (!%p226_p1), 1, %s1306_s21 }
  0x26   : > { %s1191_s26 = smov (!%p226_p1), [#allocation2]   ;;  %s1539_s1 = sld [smem:[#allocation52_spill]] (!%p226_p1) }
  0x27   : > { %s291_s27 = sshll.u32 (!%p226_p1), %s1191_s26, 4  ;;  %s1318_s14 = sld [smem:[#allocation5 + %s295_s24]] (!%p226_p1)  ;;  %s1316_s27 = int_to_ptr.vmem [resolvable:$true] %s291_s27 }
  0x28   : > { %s260_s23 = scalar_select %p259_p2, %s1180_s8, 1 }
  0x29   : > { %s1192_s19 = smov [#allocation2 + $0x1]  }
  0x2a   : > { %s815_s25 = sshll.u32 %s260_s23, 3  ;;  %s307_s13 = sshll.u32 %s1192_s19, 4  ;;  %s1323_s13 = int_to_ptr.vmem [resolvable:$true] %s307_s13 }
  0x2b   : > { %s817_s16 = sshll.u32 %s281_s22, 4 }
  0x2c   : > { %s1314_s12 = scalar_lea.vmem %s1539_s1, %s815_s25  ;;  %s283_s0 = scalar_lea.hbm %s1513_s2, %s817_s16 }
  0x2d   : > { %s932_s23 = scalar_lea.hbm %s283_s0, 16  ;;  %s1328_s25 = scalar_lea.hbm %s1513_s2, 1024 }
  0x2e   : > { %p933_p3 = scmp.ne.s32.totalorder %s283_s0, %s932_s23  ;;  %p935_p4 = scmp.lt.s32.totalorder %s283_s0, %s1513_s2 }
  0x2f   : > { %p936_p5 = scmp.lt.s32.totalorder %s1328_s25, %s932_s23 }
  0x31   : > { %p937_p6 = por %p936_p5, %p935_p4 }
  0x33   : > { %p938_p7 = pnand %p937_p6, %p933_p3 }
  0x35   : > { %941 = shalt.err (!%p938_p7)  }
  0x36   : > { %s942_s9 = scalar_lea.vmem %s1316_s27, 16  ;;  %s1337_s18 = scalar_lea.vmem %s1316_s27, 256 }
  0x37   : > { %p943_p8 = scmp.ne.s32.totalorder %s1316_s27, %s942_s9  ;;  %p947_p10 = scmp.lt.s32.totalorder %s1316_s27, %s1316_s27 }
  0x38   : > { %p948_p11 = scmp.lt.s32.totalorder %s1337_s18, %s942_s9 }
  0x3a   : > { %p949_p12 = por %p948_p11, %p947_p10 }
  0x3c   : > { %p950_p0 = pnand %p949_p12, %p943_p8 }
  0x3e   : > { %953 = shalt.err (!%p950_p0)  }
  0x3f   : > { %294 = dma.hbm_to_vmem [thread:$0]  %s283_s0, 16, %s1316_s27, [#allocation3] }
  0x40   : > { %s311_s17 = sadd.s32 2, %s1306_s21  ;;  %s1193_s22 = smov [#allocation2 + $0x2]  }
  0x41   : > { %s1344_s19 = sld [smem:[#allocation5 + %s311_s17]]  ;;  %s323_s24 = sshll.u32 %s1193_s22, 4  ;;  %s1347_s24 = int_to_ptr.vmem [resolvable:$true] %s323_s24 }
  0x42   : > { %s818_s16 = sshll.u32 %s1318_s14, 4  ;;  %s327_s11 = sadd.s32 3, %s1306_s21 }
  0x43   : > { %s298_s28 = scalar_lea.hbm %s1513_s2, %s818_s16 }
  0x44   : > { %s954_s9 = scalar_lea.hbm %s298_s28, 16  ;;  %p957_p2 = scmp.lt.s32.totalorder %s298_s28, %s1513_s2 }
  0x45   : > { %p955_p1 = scmp.ne.s32.totalorder %s298_s28, %s954_s9  ;;  %p958_p3 = scmp.lt.s32.totalorder %s1328_s25, %s954_s9 }
  0x47   : > { %p959_p4 = por %p958_p3, %p957_p2 }
  0x49   : > { %p960_p5 = pnand %p959_p4, %p955_p1 }
  0x4b   : > { %963 = shalt.err (!%p960_p5)  }
  0x4c   : > { %s964_s0 = scalar_lea.vmem %s1323_s13, 16  ;;  %p969_p7 = scmp.lt.s32.totalorder %s1323_s13, %s1316_s27 }
  0x4d   : > { %p965_p6 = scmp.ne.s32.totalorder %s1323_s13, %s964_s0  ;;  %p970_p8 = scmp.lt.s32.totalorder %s1337_s18, %s964_s0 }
  0x4f   : > { %p971_p10 = por %p970_p8, %p969_p7 }
  0x51   : > { %p972_p11 = pnand %p971_p10, %p965_p6 }
  0x53   : > { %975 = shalt.err (!%p972_p11)  }
  0x54   : > { %310 = dma.hbm_to_vmem [thread:$0]  %s298_s28, 16, %s1323_s13, [#allocation3] }
  0x55   : > { %s328_s1 = sld [smem:[#allocation5 + %s327_s11]]  ;;  %s1194_s29 = smov [#allocation2 + $0x3]  }
  0x56   : > { %s339_s14 = sshll.u32 %s1194_s29, 4  ;;  %s343_s17 = sadd.s32 4, %s1306_s21  ;;  %s1365_s14 = int_to_ptr.vmem [resolvable:$true] %s339_s14 }
  0x57   : > { %s819_s22 = sshll.u32 %s1344_s19, 4  ;;  %s1370_s9 = sld [smem:[#allocation5 + %s343_s17]] }
  0x58   : > { %s314_s26 = scalar_lea.hbm %s1513_s2, %s819_s22 }
  0x59   : > { %s976_s0 = scalar_lea.hbm %s314_s26, 16  ;;  %p979_p0 = scmp.lt.s32.totalorder %s314_s26, %s1513_s2 }
  0x5a   : > { %p977_p12 = scmp.ne.s32.totalorder %s314_s26, %s976_s0  ;;  %p980_p1 = scmp.lt.s32.totalorder %s1328_s25, %s976_s0 }
  0x5c   : > { %p981_p2 = por %p980_p1, %p979_p0 }
  0x5e   : > { %p982_p3 = pnand %p981_p2, %p977_p12 }
  0x60   : > { %985 = shalt.err (!%p982_p3)  }
  0x61   : > { %s986_s13 = scalar_lea.vmem %s1347_s24, 16  ;;  %p991_p5 = scmp.lt.s32.totalorder %s1347_s24, %s1316_s27 }
  0x62   : > { %p987_p4 = scmp.ne.s32.totalorder %s1347_s24, %s986_s13  ;;  %p992_p6 = scmp.lt.s32.totalorder %s1337_s18, %s986_s13 }
  0x64   : > { %p993_p7 = por %p992_p6, %p991_p5 }
  0x66   : > { %p994_p8 = pnand %p993_p7, %p987_p4 }
  0x68   : > { %997 = shalt.err (!%p994_p8)  }
  0x69   : > { %326 = dma.hbm_to_vmem [thread:$0]  %s314_s26, 16, %s1347_s24, [#allocation3] }
  0x6a   : > { %s359_s7 = sadd.s32 5, %s1306_s21  ;;  %s820_s10 = sshll.u32 %s328_s1, 4 }
  0x6b   : > { %s1195_s19 = smov [#allocation2 + $0x4]   ;;  %s330_s17 = scalar_lea.hbm %s1513_s2, %s820_s10 }
  0x6c   : > { %s355_s28 = sshll.u32 %s1195_s19, 4  ;;  %s998_s22 = scalar_lea.hbm %s330_s17, 16  ;;  %s1386_s28 = int_to_ptr.vmem [resolvable:$true] %s355_s28 }
  0x6d   : > { %p999_p10 = scmp.ne.s32.totalorder %s330_s17, %s998_s22  ;;  %p1001_p11 = scmp.lt.s32.totalorder %s330_s17, %s1513_s2 }
  0x6e   : > { %p1002_p12 = scmp.lt.s32.totalorder %s1328_s25, %s998_s22 }
  0x70   : > { %p1003_p0 = por %p1002_p12, %p1001_p11 }
  0x72   : > { %p1004_p1 = pnand %p1003_p0, %p999_p10 }
  0x74   : > { %1007 = shalt.err (!%p1004_p1)  }
  0x75   : > { %s1008_s24 = scalar_lea.vmem %s1365_s14, 16  ;;  %p1013_p3 = scmp.lt.s32.totalorder %s1365_s14, %s1316_s27 }
  0x76   : > { %p1009_p2 = scmp.ne.s32.totalorder %s1365_s14, %s1008_s24  ;;  %p1014_p4 = scmp.lt.s32.totalorder %s1337_s18, %s1008_s24 }
  0x78   : > { %p1015_p5 = por %p1014_p4, %p1013_p3 }
  0x7a   : > { %p1016_p6 = pnand %p1015_p5, %p1009_p2 }
  0x7c   : > { %1019 = shalt.err (!%p1016_p6)  }
  0x7d   : > { %342 = dma.hbm_to_vmem [thread:$0]  %s330_s17, 16, %s1365_s14, [#allocation3] }
  0x7e   : > { %s821_s1 = sshll.u32 %s1370_s9, 4  ;;  %s360_s26 = sld [smem:[#allocation5 + %s359_s7]] }
  0x7f   : > { %s346_s10 = scalar_lea.hbm %s1513_s2, %s821_s1 }
  0x80   : > { %s1020_s19 = scalar_lea.hbm %s346_s10, 16  ;;  %p1023_p8 = scmp.lt.s32.totalorder %s346_s10, %s1513_s2 }
  0x81   : > { %p1021_p7 = scmp.ne.s32.totalorder %s346_s10, %s1020_s19  ;;  %p1024_p10 = scmp.lt.s32.totalorder %s1328_s25, %s1020_s19 }
  0x83   : > { %p1025_p11 = por %p1024_p10, %p1023_p8 }
  0x85   : > { %p1026_p12 = pnand %p1025_p11, %p1021_p7 }
  0x87   : > { %1029 = shalt.err (!%p1026_p12)  }
  0x88   : > { %s1030_s14 = scalar_lea.vmem %s1386_s28, 16  ;;  %p1035_p1 = scmp.lt.s32.totalorder %s1386_s28, %s1316_s27 }
  0x89   : > { %p1031_p0 = scmp.ne.s32.totalorder %s1386_s28, %s1030_s14  ;;  %p1036_p2 = scmp.lt.s32.totalorder %s1337_s18, %s1030_s14 }
  0x8b   : > { %p1037_p3 = por %p1036_p2, %p1035_p1 }
  0x8d   : > { %p1038_p4 = pnand %p1037_p3, %p1031_p0 }
  0x8f   : > { %1041 = shalt.err (!%p1038_p4)  }
  0x90   : > { %358 = dma.hbm_to_vmem [thread:$0]  %s346_s10, 16, %s1386_s28, [#allocation3] }
  0x91   : > { %s1196_s9 = smov [#allocation2 + $0x5]   ;;  %s375_s17 = sadd.s32 6, %s1306_s21 }
  0x92   : > { %s371_s7 = sshll.u32 %s1196_s9, 4  ;;  %s376_s22 = sld [smem:[#allocation5 + %s375_s17]]  ;;  %s372_s7 = int_to_ptr.vmem [resolvable:$true] %s371_s7 }
  0x93   : > { %s391_s16 = sadd.s32 7, %s1306_s21  ;;  %s822_s23 = sshll.u32 %s360_s26, 4 }
  0x94   : > { %s1197_s24 = smov [#allocation2 + $0x6]   ;;  %s362_s19 = scalar_lea.hbm %s1513_s2, %s822_s23 }
  0x95   : > { %s387_s1 = sshll.u32 %s1197_s24, 4  ;;  %s1042_s11 = scalar_lea.hbm %s362_s19, 16  ;;  %s1417_s1 = int_to_ptr.vmem [resolvable:$true] %s387_s1 }
  0x96   : > { %p1043_p5 = scmp.ne.s32.totalorder %s362_s19, %s1042_s11  ;;  %p1045_p6 = scmp.lt.s32.totalorder %s362_s19, %s1513_s2 }
  0x97   : > { %p1046_p7 = scmp.lt.s32.totalorder %s1328_s25, %s1042_s11 }
  0x99   : > { %p1047_p8 = por %p1046_p7, %p1045_p6 }
  0x9b   : > { %p1048_p10 = pnand %p1047_p8, %p1043_p5 }
  0x9d   : > { %1051 = shalt.err (!%p1048_p10)  }
  0x9e   : > { %s1052_s21 = scalar_lea.vmem %s372_s7, 16  ;;  %p1057_p12 = scmp.lt.s32.totalorder %s372_s7, %s1316_s27 }
  0x9f   : > { %p1053_p11 = scmp.ne.s32.totalorder %s372_s7, %s1052_s21  ;;  %p1058_p0 = scmp.lt.s32.totalorder %s1337_s18, %s1052_s21 }
  0xa1   : > { %p1059_p1 = por %p1058_p0, %p1057_p12 }
  0xa3   : > { %p1060_p2 = pnand %p1059_p1, %p1053_p11 }
  0xa5   : > { %1063 = shalt.err (!%p1060_p2)  }
  0xa6   : > { %374 = dma.hbm_to_vmem [thread:$0]  %s362_s19, 16, %s372_s7, [#allocation3] }
  0xa7   : > { %s392_s28 = sld [smem:[#allocation5 + %s391_s16]]  ;;  %s823_s26 = sshll.u32 %s376_s22, 4 }
  0xa8   : > { %s378_s17 = scalar_lea.hbm %s1513_s2, %s823_s26  ;;  %s1198_s23 = smov [#allocation2 + $0x7]  }
  0xa9   : > { %s403_s24 = sshll.u32 %s1198_s23, 4  ;;  %s1064_s0 = scalar_lea.hbm %s378_s17, 16  ;;  %s404_s24 = int_to_ptr.vmem [resolvable:$true] %s403_s24 }
  0xaa   : > { %p1065_p3 = scmp.ne.s32.totalorder %s378_s17, %s1064_s0  ;;  %p1067_p4 = scmp.lt.s32.totalorder %s378_s17, %s1513_s2 }
  0xab   : > { %p1068_p5 = scmp.lt.s32.totalorder %s1328_s25, %s1064_s0 }
  0xad   : > { %p1069_p6 = por %p1068_p5, %p1067_p4 }
  0xaf   : > { %p1070_p7 = pnand %p1069_p6, %p1065_p3 }
  0xb1   : > { %1073 = shalt.err (!%p1070_p7)  }
  0xb2   : > { %s1074_s7 = scalar_lea.vmem %s1417_s1, 16  ;;  %p1079_p10 = scmp.lt.s32.totalorder %s1417_s1, %s1316_s27 }
  0xb3   : > { %p1075_p8 = scmp.ne.s32.totalorder %s1417_s1, %s1074_s7  ;;  %p1080_p11 = scmp.lt.s32.totalorder %s1337_s18, %s1074_s7 }
  0xb5   : > { %p1081_p12 = por %p1080_p11, %p1079_p10 }
  0xb7   : > { %p1082_p0 = pnand %p1081_p12, %p1075_p8 }
  0xb9   : > { %1085 = shalt.err (!%p1082_p0)  }
  0xba   : > { %390 = dma.hbm_to_vmem [thread:$0]  %s378_s17, 16, %s1417_s1, [#allocation3] }
  0xbb   : > { %s824_s22 = sshll.u32 %s392_s28, 4 }
  0xbc   : > { %s394_s29 = scalar_lea.hbm %s1513_s2, %s824_s22 }
  0xbd   : > { %s1086_s14 = scalar_lea.hbm %s394_s29, 16  ;;  %p1089_p2 = scmp.lt.s32.totalorder %s394_s29, %s1513_s2 }
  0xbe   : > { %p1087_p1 = scmp.ne.s32.totalorder %s394_s29, %s1086_s14  ;;  %p1090_p3 = scmp.lt.s32.totalorder %s1328_s25, %s1086_s14 }
  0xc0   : > { %p1091_p4 = por %p1090_p3, %p1089_p2 }
  0xc2   : > { %p1092_p5 = pnand %p1091_p4, %p1087_p1 }
  0xc4   : > { %1095 = shalt.err (!%p1092_p5)  }
  0xc5   : > { %s1096_s10 = scalar_lea.vmem %s404_s24, 16  ;;  %p1101_p7 = scmp.lt.s32.totalorder %s404_s24, %s1316_s27 }
  0xc6   : > { %p1097_p6 = scmp.ne.s32.totalorder %s404_s24, %s1096_s10  ;;  %p1102_p8 = scmp.lt.s32.totalorder %s1337_s18, %s1096_s10 }
  0xc8   : > { %p1103_p10 = por %p1102_p8, %p1101_p7 }
  0xca   : > { %p1104_p11 = pnand %p1103_p10, %p1097_p6 }
  0xcc   : > { %1107 = shalt.err (!%p1104_p11)  }
  0xcd   : > { %406 = dma.hbm_to_vmem [thread:$0]  %s394_s29, 16, %s404_s24, [#allocation3] }
  0xce   : > { %s258_s1 = scalar_lea.vmem [#allocation6], %s1303_s20 }
  0xcf   : > { %1160 = dma.done.wait [#allocation3], 128 }
  0xd0   : > { %1161 = vsyncadd [#allocation3], 4294967168  ;;  %v1199_v0 = vmov 0   ;;  %v573_v1 = vld [vmem:[%s1314_s12] sm:$0xff]  ;;  %s847_s7 = sshll.u32 %s1180_s8, 7  ;;  %s650_s22 = sshll.u32 %s258_s1, 4  ;;  %s651_s22 = int_to_ptr.vmem [resolvable:$true] %s650_s22 }
  0xd1   : > { %917 = vset.pattern.permute.xlu0 %v1199_v0  ;;  %vm576_vm0 = vcmp.eq.s32.totalorder %v573_v1, 1  ;;  %vm574_vm1 = vcmp.eq.s32.totalorder %v573_v1, 0  ;;  %v841_v5 = vld [vmem:[%s1514_s3 + $0x1] ss:$0 sm:$0xff]  ;;  %v842_v6 = vld [vmem:[%s1514_s3 + $0x2] ss:$0 sm:$0xff] }
  0xd2   : > { %v579_v2 = vsel %vm576_vm0, 1, %v1199_v0  ;;  %v593_v3 = vsel %vm574_vm1, 1, %v1199_v0  ;;  %v843_v7 = vld [vmem:[%s1514_s3] ss:$0 sm:$0xff]  ;;  %s1540_s29 = sld [smem:[#allocation53_spill]]  ;;  %s1542_s26 = sand.u32 1, %s1172_s30  }
  0xd3   : > { %581 = vperm.xlu0 %917, %v579_v2   ;;  %v572_v9 = vld [vmem:[#allocation2] sm:$0xff]  ;;  %s636_s10 = scalar_lea.sflag [#allocation7], %s1542_s26  ;;  %s1108_s27 = scalar_lea.vmem %s651_s22, 128 }
  0xd4   : > { %v604_v12 = vld [vmem:[%s1515_s4] sm:$0xff]  ;;  %p1109_p12 = scmp.ne.s32.totalorder %s651_s22, %s1108_s27  ;;  %s1200_s25 = smov [#allocation6]  }
  0xd5   : > { %v844_v23 = vld [vmem:[%s1516_s5] ss:$0 sm:$0xff]  ;;  %s1112_s8 = sshll.u32 %s1200_s25, 4  ;;  %s1113_s8 = int_to_ptr.vmem [resolvable:$false] %s1112_s8 }
  0xd6   : > { %v845_v25 = vld [vmem:[%s1517_s6] ss:$0 sm:$0xff]  ;;  %p1110_p0 = pnand %p1109_p12, %p1284_p9  ;;  %s1114_s18 = scalar_lea.vmem %s1113_s8, 256 }
  0xd7   : > { %595 = vperm.xlu0 %917, %v593_v3   ;;  %p1115_p2 = scmp.lt.s32.totalorder %s651_s22, %s1113_s8  ;;  %p1116_p3 = scmp.lt.s32.totalorder %s1114_s18, %s1108_s27 }
  0xd8   : > { %s1541_s14 = smov %s1540_s29  ;;  %s648_s21 = scalar_lea.hbm %s1540_s29, %s847_s7 }
  0xd9   : > { %p1111_p1 = pneg %p1110_p0  ;;  %p1117_p4 = por %p1116_p3, %p1115_p2 }
  0xdb   : > { %p1118_p5 = pnand %p1117_p4, %p1111_p1 }
 0x14e   : > { %v582_v4 = vpop.permute.xlu0 %581 }
 0x14f   : > { %vm583_vm2 = vcmp.eq.s32.totalorder %v582_v4, 1 }
 0x150   : > { %v592_v10 = vsel %vm583_vm2, %v841_v5, %v842_v6 }
 0x152   : > { %v596_v8 = vpop.permute.xlu0 %595 }
 0x153   : > { %vm597_vm3 = vcmp.eq.s32.totalorder %v596_v8, 1 }
 0x154   : > { %v602_v11 = vsel %vm597_vm3, %v843_v7, %v592_v10 }
 0x155   : > { %v603_v13 = vadd.f32 %v602_v11, %v572_v9 }
 0x157   : > { %v605_v14 = vadd.f32 %v604_v12, %v603_v13 }
 0x159   : > { %606 = vadd.xlane.f32.xlu1 %v605_v14 }
 0x1e2   : > { %v607_v15 = vpop.xlane.xlu1 %606 }
 0x1e3   : > { %v609_v16 = vmul.f32 0.0078125, %v607_v15 }
 0x1e5   : > { %v610_v17 = vsub.f32 %v605_v14, %v609_v16 }
 0x1e7   : > { %v611_v18 = vmul.f32 %v610_v17, %v610_v17 }
 0x1e9   : > { %612 = vadd.xlane.f32.xlu1 %v611_v18 }
 0x272   : > { %v613_v19 = vpop.xlane.xlu1 %612 }
 0x273   : > { %v614_v20 = vmul.f32 0.0078125, %v613_v19 }
 0x275   : > { %v615_v21 = vadd.f32 1e-05, %v614_v20 }
 0x277   : > { %918 = vrsqrt.f32 %v615_v21 }
 0x284   : > { %v919_v22 = vpop.eup %918 }
 0x285   : > { %v617_v24 = vmul.f32 %v919_v22, %v610_v17 }
 0x287   : > { %v625_v26 = vmul.f32 %v844_v23, %v617_v24 }
 0x289   : > { %v633_v27 = vadd.f32 %v845_v25, %v625_v26 }
 0x28b   : > { %634 = vst [vmem:[%s258_s1] sm:$0xff] %v633_v27 }
 0x28c   : > { %1121 = shalt.err (!%p1118_p5)
}
 0x28d   : > { %s1122_s28 = scalar_lea.hbm %s648_s21, 128  ;;  %s1126_s9 = scalar_lea.hbm %s1541_s14, 256 }
 0x28e   : > { %p1123_p6 = scmp.ne.s32.totalorder %s648_s21, %s1122_s28  ;;  %p1127_p10 = scmp.lt.s32.totalorder %s648_s21, %s1541_s14 }
 0x28f   : > { %p1128_p11 = scmp.lt.s32.totalorder %s1126_s9, %s1122_s28 }
 0x290   : > { %p1124_p7 = pnand %p1123_p6, %p1284_p9 }
 0x291   : > { %p1129_p12 = por %p1128_p11, %p1127_p10 }
 0x292   : > { %p1125_p8 = pneg %p1124_p7 }
 0x294   : > { %p1130_p0 = pnand %p1129_p12, %p1125_p8 }
 0x296   : > { %1133 = shalt.err (!%p1130_p0)
}
 0x297   : > { %852 = dma.vmem_to_hbm [thread:$0]  (%p1284_p9), %s651_s22, 128, %s648_s21, %s636_s10  }
 0x298 PF: > { %s1543_s23 = sld [smem:[#allocation48_spill]] }
 0x299   : > { %s1544_s24 = sld [smem:[#allocation45_spill]] }
 0x29e   : > { %p858_p1 = scmp.ge.s32.totalorder %s1543_s23, 2 }
 0x29f   : > { %s662_s13 = sand.u32 1, %s1544_s24  }
 0x2a0   : > { %p855_p2 = pnand %p858_p1, %p1291_p13  ;;  %s663_s11 = scalar_lea.sflag [#allocation7], %s662_s13 }
 0x2a2   : > { %p856_p3 = pneg %p855_p2 }
 0x2a4   : > { %1163 = dma.done.wait (%p856_p3), %s663_s11, 128  }
 0x2a5   : > { %1165 = vsyncadd (%p856_p3), %s663_s11, 4294967168  ;;  %s26_s10 = sadd.s32 1, %s1543_s23   ;;  %s1546_s7 = sld [smem:[#allocation46_spill]] }
 0x2a6   : > { %p23_p4 = scmp.ge.s32.totalorder %s26_s10, 4   ;;  %s1547_s0 = sld [smem:[#allocation51_spill]] }
 0x2a7   : > { %s1548_s8 = sld [smem:[#allocation47_spill]]  ;;  %s1550_s29 = smov %s1172_s30 }
 0x2a8   : > { %s1549_s9 = sld [smem:[#allocation49_spill]]  ;;  %25 = sbr.rel (!%p23_p4) target bundleno = 20 (0x14), region = 185 }
 0x2ab   : > { %s1551_s30 = smov %s1546_s7 }
 0x2ad   :  { %668 = vsyncpa [#allocation7], 1 }
 0x2ae   :  { %670 = vsyncpa [#allocation7 + $0x1], 1 }
 0x2af   :  { %671 = vsyncmov [#allocation3] }
 0x2b2   :  { %s672_s15 = vpop.sfrf %671 }
 0x2b3   :  { %p850_p9 = scmp.ne.s32.totalorder %s672_s15, 0 }
 0x2b5   :  { %676 = shalt.err (%p850_p9)  }
 0x2b6   :  { %678 = vsyncmov [#allocation3 + $0x1] }
 0x2b9   :  { %s679_s22 = vpop.sfrf %678 }
 0x2ba   :  { %p851_p13 = scmp.ne.s32.totalorder %s679_s22, 0 }
 0x2bc   :  { %683 = shalt.err (%p851_p13)  }

</bundles_post_ra>
